<compile_context>
chip_gen: v5e
topology: v5e:2x2
jax: 0.10.0
libtpu: 0.0.40
codegen_flags: <defaults>
</compile_context>

<pallas_src>
import functools
import math

import jax
import jax.numpy as jnp
import numpy as np
from jax import lax
from jax.experimental import pallas as pl
from jax.experimental.pallas import tpu as pltpu


def _pick_strips_per_step(Hp, B):
    """Patch-rows (strips) per grid step: a multiple of 8 dividing Hp, capped for VMEM."""
    cands = [t for t in range(8, min(Hp, 64) + 1, 8) if Hp % t == 0]
    if not cands:
        return Hp
    th = max(cands)
    # With a single image, keep >= 2 grid steps so both v7x TensorCores get work.
    if B == 1 and th == Hp:
        smaller = [t for t in cands if t < Hp]
        if smaller:
            th = max(smaller)
    return th


def _patch_embed_kernel(x_ref, w_ref, prm_ref, grp_ref, o_ref, *,
                        C, P, W, SW, G, D, Wpp, TH, apply_norm, eps, compute_dtype):
    """One grid step = TH patch-rows (strips) of one image.

    x_ref  : (1, C, TH, P*W)  raw input strips (original dtype; cast in-kernel after the DMA)
    w_ref  : (C*P, SW, GD)    packed block-diagonal projection weight, GD on lanes (bf16)
    prm_ref: (3, GD)          [bias; gamma; beta], each tiled over the G patch groups (f32)
    grp_ref: (G, GD)          0/1 group membership: grp[k, j*D + d] = (k == j)  (f32)
    o_ref  : (TH, Wp*D)       packed output rows (lane-dense reinterpretation of (Hp, Wp, D))
    """
    GD = G * D
    inv_d = 1.0 / float(D)

    bias_row = prm_ref[0:1, :]
    gamma_row = prm_ref[1:2, :]
    beta_row = prm_ref[2:3, :]
    grp = grp_ref[...] if (apply_norm and G > 1) else None

    for w4 in range(Wpp):                       # static unroll over packed lane blocks
        acc = jnp.zeros((TH, GD), jnp.float32)
        for c in range(C):                      # C, P are tiny: fully unrolled
            for q in range(P):
                # (TH, SW) slab: row t = strip t, lane sp = pixel (row q, column w4*SW + sp)
                # of the G consecutive patches packed into output lane block w4.
                sl = x_ref[0, c, :, pl.ds(q * W + w4 * SW, SW)]
                acc = acc + jnp.dot(sl.astype(compute_dtype), w_ref[c * P + q],
                                    preferred_element_type=jnp.float32)

        y = acc + bias_row
        if apply_norm:
            if G == 1:
                mean = jnp.sum(y, axis=-1, keepdims=True) * inv_d
                diff = y - mean
                var = jnp.sum(diff * diff, axis=-1, keepdims=True) * inv_d
                inv = lax.rsqrt(var + eps)
            else:
                # Factorized per-patch statistics: reduce (TH, GD) -> (TH, G) with the 0/1
                # membership matrix, broadcast back with the same matrix.  Two-pass variance.
                mean_g = lax.dot_general(y, grp, (((1,), (1,)), ((), ())),
                                         preferred_element_type=jnp.float32) * inv_d
                mean = jnp.dot(mean_g, grp, preferred_element_type=jnp.float32)
                diff = y - mean
                var_g = lax.dot_general(diff * diff, grp, (((1,), (1,)), ((), ())),
                                        preferred_element_type=jnp.float32) * inv_d
                inv = jnp.dot(lax.rsqrt(var_g + eps), grp,
                              preferred_element_type=jnp.float32)
            y = diff * inv * gamma_row + beta_row

        # GD is a multiple of 128 when packing applies -> vreg-aligned dense store.
        o_ref[:, pl.ds(w4 * GD, GD)] = y.astype(o_ref.dtype)


def patch_embed_2d(x, w, b, gamma=None, beta=None, *, patch_size=4, apply_norm=True,
                   eps=1e-5, compute_dtype=jnp.bfloat16, out_dtype=None):
    """Fused PatchEmbed2D forward.

    x: (B, C, H, W) NCHW.  w: (D, C, P, P) Conv2d(kernel=stride=P) weight.  b: (D,) bias.
    gamma/beta: (D,) LayerNorm params (used when apply_norm=True).
    Returns (B, H/P, W/P, D) = proj(x).permute(0, 2, 3, 1) [+ LayerNorm], in bf16 by default.
    """
    B, C, H, W = x.shape
    P = int(patch_size)
    D = int(w.shape[0])
    if out_dtype is None:
        out_dtype = compute_dtype     # bf16 output by default: the store stream dominates HBM.
    assert H % P == 0 and W % P == 0, "spatial dims must be divisible by patch_size"
    Hp, Wp = H // P, W // P

    # Lane packing: G consecutive patches along W share one GD = G*D lane block so stores and
    # the projection matmul's N dim are 128-lane aligned.  Falls back to G = 1 otherwise.
    g = 128 // math.gcd(D, 128)
    G = g if Wp % g == 0 else 1
    GD = G * D
    SW = G * P
    Wpp = Wp // G

    TH = _pick_strips_per_step(Hp, B)
    HB = Hp // TH
    assert TH % 8 == 0 or (B == 1 and HB == 1), (
        "TODO(synk): pad Hp to a multiple of 8 strips for this shape")

    cdt = compute_dtype
    PW = P * W
    WpD = Wp * D

    # ---- trace-time constants (all tiny) ----------------------------------------------------
    # Packed weight: wpk[c*P + q, j*P + p, k*D + d] = w[d, c, q, p] * (j == k); lanes = GD.
    wpk = jnp.einsum("dcqp,jk->cqjpkd", w.astype(jnp.float32),
                     jnp.eye(G, dtype=jnp.float32))
    wpk = wpk.reshape(C * P, SW, GD).astype(cdt)

    if gamma is None:
        gamma = jnp.ones((D,), jnp.float32)
    if beta is None:
        beta = jnp.zeros((D,), jnp.float32)
    prm = jnp.stack([jnp.tile(b.astype(jnp.float32), G),
                     jnp.tile(gamma.astype(jnp.float32), G),
                     jnp.tile(beta.astype(jnp.float32), G)], axis=0)           # (3, GD)

    # 0/1 group-membership matrix (reduce to per-patch stats and broadcast them back).
    grp = jnp.kron(jnp.eye(G, dtype=jnp.float32), jnp.ones((1, D), jnp.float32))  # (G, GD)

    # Free, contiguous views: no wrapper-side cast or transpose, no extra HBM pass over x.
    x3 = x.reshape(B, C, Hp, PW)

    kernel = functools.partial(_patch_embed_kernel, C=C, P=P, W=W, SW=SW, G=G, D=D,
                               Wpp=Wpp, TH=TH, apply_norm=apply_norm, eps=float(eps),
                               compute_dtype=cdt)

    out = pl.pallas_call(
        kernel,
        out_shape=jax.ShapeDtypeStruct((B * Hp, WpD), out_dtype),
        grid_spec=pltpu.PrefetchScalarGridSpec(
            num_scalar_prefetch=0,
            grid=(B, HB),
            in_specs=[
                pl.BlockSpec((1, C, TH, PW), lambda bi, hi: (bi, 0, hi, 0)),
                pl.BlockSpec((C * P, SW, GD), lambda bi, hi: (0, 0, 0)),
                pl.BlockSpec((3, GD), lambda bi, hi: (0, 0)),
                pl.BlockSpec((G, GD), lambda bi, hi: (0, 0)),
            ],
            out_specs=pl.BlockSpec((TH, WpD), lambda bi, hi: (bi * HB + hi, 0)),
        ),
        compiler_params=pltpu.CompilerParams(
            dimension_semantics=("parallel", "parallel")),
    )(x3, wpk, prm, grp)

    # Free reinterpretation of the packed rows back to (B, Hp, Wp, D).
    return out.reshape(B, Hp, Wp, D)


if __name__ == "__main__":
    # Small shapes consistent with the module defaults: patch_size=4, in_chans=3.
    B, C, H, W = 2, 3, 32, 32
    P = 4
    embed_dim = 32

    key = jax.random.PRNGKey(0)
    kx, kw, kb, kg, kbe = jax.random.split(key, 5)

    x = jax.random.normal(kx, (B, C, H, W), dtype=jnp.float32)
    w = jax.random.normal(kw, (embed_dim, C, P, P), dtype=jnp.float32) * 0.02
    bias = jax.random.normal(kb, (embed_dim,), dtype=jnp.float32) * 0.02
    gamma = 1.0 + 0.1 * jax.random.normal(kg, (embed_dim,), dtype=jnp.float32)
    beta = 0.1 * jax.random.normal(kbe, (embed_dim,), dtype=jnp.float32)

    out = patch_embed_2d(x, w, bias, gamma, beta, patch_size=P, apply_norm=True)
    out = jax.block_until_ready(out)

    # Reference (numpy/f64) using the same bf16 rounding of the MXU inputs as the kernel.
    xr = np.asarray(x.astype(jnp.bfloat16).astype(jnp.float32), dtype=np.float64)
    wr = np.asarray(w.astype(jnp.bfloat16).astype(jnp.float32), dtype=np.float64)
    Hp, Wp = H // P, W // P
    patches = xr.reshape(B, C, Hp, P, Wp, P).transpose(0, 2, 4, 1, 3, 5).reshape(-1, C * P * P)
    ref = patches @ wr.reshape(embed_dim, -1).T + np.asarray(bias, np.float64)
    mean = ref.mean(-1, keepdims=True)
    var = ((ref - mean) ** 2).mean(-1, keepdims=True)
    ref = (ref - mean) / np.sqrt(var + 1e-5) * np.asarray(gamma, np.float64) \
        + np.asarray(beta, np.float64)
    ref = ref.reshape(B, Hp, Wp, embed_dim)

    # Output is bf16 by default -> allow ~0.4% relative (O(1) post-LayerNorm values).
    err = np.max(np.abs(np.asarray(out, np.float64) - ref))
    assert err < 6e-2, f"mismatch vs reference, max abs err = {err}"
    print("KERNEL_OK")
</pallas_src>

<mosaic_0001>
module attributes {stable_mosaic.version = 11 : i64} {
  func.func @_patch_embed_kernel(%arg0: i32, %arg1: i32, %arg2: memref<1x3x8x128xf32, #tpu.memory_space<vmem>>, %arg3: memref<12x16x128xbf16, #tpu.memory_space<vmem>>, %arg4: memref<3x128xf32, #tpu.memory_space<vmem>>, %arg5: memref<4x128xf32, #tpu.memory_space<vmem>>, %arg6: memref<8x256xbf16, #tpu.memory_space<vmem>>) attributes {dimension_semantics = [#tpu.dimension_semantics<parallel>, #tpu.dimension_semantics<parallel>], iteration_bounds = array<i64: 2, 1>, scalar_prefetch = 0 : i64, scratch_operands = 0 : i64, tpu.core_type = #tpu.core_type<tc>, window_params = [{transform_indices = @transform_0, window_bounds = array<i64: 1, 3, 8, 128>}, {pipeline_mode = #tpu.pipeline_mode<synchronous>, transform_indices = @transform_1, window_bounds = array<i64: 12, 16, 128>}, {pipeline_mode = #tpu.pipeline_mode<synchronous>, transform_indices = @transform_2, window_bounds = array<i64: 3, 128>}, {pipeline_mode = #tpu.pipeline_mode<synchronous>, transform_indices = @transform_3, window_bounds = array<i64: 4, 128>}, {transform_indices = @transform_4, window_bounds = array<i64: 8, 256>}]} {
    %c0 = arith.constant 0 : index
    %c0_0 = arith.constant 0 : index
    %0 = vector.load %arg4[%c0, %c0_0] : memref<3x128xf32, #tpu.memory_space<vmem>>, vector<1x128xf32>
    %c1 = arith.constant 1 : index
    %c0_1 = arith.constant 0 : index
    %1 = vector.load %arg4[%c1, %c0_1] : memref<3x128xf32, #tpu.memory_space<vmem>>, vector<1x128xf32>
    %c2 = arith.constant 2 : index
    %c0_2 = arith.constant 0 : index
    %2 = vector.load %arg4[%c2, %c0_2] : memref<3x128xf32, #tpu.memory_space<vmem>>, vector<1x128xf32>
    %c0_3 = arith.constant 0 : index
    %c0_4 = arith.constant 0 : index
    %3 = vector.load %arg5[%c0_3, %c0_4] : memref<4x128xf32, #tpu.memory_space<vmem>>, vector<4x128xf32>
    %cst = arith.constant 0.000000e+00 : f32
    %4 = vector.broadcast %cst : f32 to vector<8x128xf32>
    %c0_5 = arith.constant 0 : index
    %c0_6 = arith.constant 0 : index
    %c0_7 = arith.constant 0 : index
    %c0_8 = arith.constant 0 : index
    %5 = vector.load %arg2[%c0_5, %c0_6, %c0_7, %c0_8] : memref<1x3x8x128xf32, #tpu.memory_space<vmem>>, vector<1x1x8x16xf32>
    %6 = vector.shape_cast %5 : vector<1x1x8x16xf32> to vector<8x16xf32>
    %7 = arith.truncf %6 : vector<8x16xf32> to vector<8x16xbf16>
    %c0_9 = arith.constant 0 : index
    %c0_10 = arith.constant 0 : index
    %c0_11 = arith.constant 0 : index
    %8 = vector.load %arg3[%c0_9, %c0_10, %c0_11] : memref<12x16x128xbf16, #tpu.memory_space<vmem>>, vector<1x16x128xbf16>
    %9 = vector.shape_cast %8 : vector<1x16x128xbf16> to vector<16x128xbf16>
    %cst_12 = arith.constant dense<0.000000e+00> : vector<8x128xf32>
    %10 = tpu.matmul %7, %9, %cst_12 {dimension_numbers = #tpu.dot_dimension_numbers<[1], [0], [0], [1], [0, 0, 1, 1], [], []>} : vector<8x16xbf16>, vector<16x128xbf16>, vector<8x128xf32> -> vector<8x128xf32>
    %11 = arith.addf %4, %10 : vector<8x128xf32>
    %c0_13 = arith.constant 0 : index
    %c0_14 = arith.constant 0 : index
    %c0_15 = arith.constant 0 : index
    %c32 = arith.constant 32 : index
    %12 = vector.load %arg2[%c0_13, %c0_14, %c0_15, %c32] : memref<1x3x8x128xf32, #tpu.memory_space<vmem>>, vector<1x1x8x16xf32>
    %13 = vector.shape_cast %12 : vector<1x1x8x16xf32> to vector<8x16xf32>
    %14 = arith.truncf %13 : vector<8x16xf32> to vector<8x16xbf16>
    %c1_16 = arith.constant 1 : index
    %c0_17 = arith.constant 0 : index
    %c0_18 = arith.constant 0 : index
    %15 = vector.load %arg3[%c1_16, %c0_17, %c0_18] : memref<12x16x128xbf16, #tpu.memory_space<vmem>>, vector<1x16x128xbf16>
    %16 = vector.shape_cast %15 : vector<1x16x128xbf16> to vector<16x128xbf16>
    %cst_19 = arith.constant dense<0.000000e+00> : vector<8x128xf32>
    %17 = tpu.matmul %14, %16, %cst_19 {dimension_numbers = #tpu.dot_dimension_numbers<[1], [0], [0], [1], [0, 0, 1, 1], [], []>} : vector<8x16xbf16>, vector<16x128xbf16>, vector<8x128xf32> -> vector<8x128xf32>
    %18 = arith.addf %11, %17 : vector<8x128xf32>
    %c0_20 = arith.constant 0 : index
    %c0_21 = arith.constant 0 : index
    %c0_22 = arith.constant 0 : index
    %c64 = arith.constant 64 : index
    %19 = vector.load %arg2[%c0_20, %c0_21, %c0_22, %c64] : memref<1x3x8x128xf32, #tpu.memory_space<vmem>>, vector<1x1x8x16xf32>
    %20 = vector.shape_cast %19 : vector<1x1x8x16xf32> to vector<8x16xf32>
    %21 = arith.truncf %20 : vector<8x16xf32> to vector<8x16xbf16>
    %c2_23 = arith.constant 2 : index
    %c0_24 = arith.constant 0 : index
    %c0_25 = arith.constant 0 : index
    %22 = vector.load %arg3[%c2_23, %c0_24, %c0_25] : memref<12x16x128xbf16, #tpu.memory_space<vmem>>, vector<1x16x128xbf16>
    %23 = vector.shape_cast %22 : vector<1x16x128xbf16> to vector<16x128xbf16>
    %cst_26 = arith.constant dense<0.000000e+00> : vector<8x128xf32>
    %24 = tpu.matmul %21, %23, %cst_26 {dimension_numbers = #tpu.dot_dimension_numbers<[1], [0], [0], [1], [0, 0, 1, 1], [], []>} : vector<8x16xbf16>, vector<16x128xbf16>, vector<8x128xf32> -> vector<8x128xf32>
    %25 = arith.addf %18, %24 : vector<8x128xf32>
    %c0_27 = arith.constant 0 : index
    %c0_28 = arith.constant 0 : index
    %c0_29 = arith.constant 0 : index
    %c96 = arith.constant 96 : index
    %26 = vector.load %arg2[%c0_27, %c0_28, %c0_29, %c96] : memref<1x3x8x128xf32, #tpu.memory_space<vmem>>, vector<1x1x8x16xf32>
    %27 = vector.shape_cast %26 : vector<1x1x8x16xf32> to vector<8x16xf32>
    %28 = arith.truncf %27 : vector<8x16xf32> to vector<8x16xbf16>
    %c3 = arith.constant 3 : index
    %c0_30 = arith.constant 0 : index
    %c0_31 = arith.constant 0 : index
    %29 = vector.load %arg3[%c3, %c0_30, %c0_31] : memref<12x16x128xbf16, #tpu.memory_space<vmem>>, vector<1x16x128xbf16>
    %30 = vector.shape_cast %29 : vector<1x16x128xbf16> to vector<16x128xbf16>
    %cst_32 = arith.constant dense<0.000000e+00> : vector<8x128xf32>
    %31 = tpu.matmul %28, %30, %cst_32 {dimension_numbers = #tpu.dot_dimension_numbers<[1], [0], [0], [1], [0, 0, 1, 1], [], []>} : vector<8x16xbf16>, vector<16x128xbf16>, vector<8x128xf32> -> vector<8x128xf32>
    %32 = arith.addf %25, %31 : vector<8x128xf32>
    %c0_33 = arith.constant 0 : index
    %c1_34 = arith.constant 1 : index
    %c0_35 = arith.constant 0 : index
    %c0_36 = arith.constant 0 : index
    %33 = vector.load %arg2[%c0_33, %c1_34, %c0_35, %c0_36] : memref<1x3x8x128xf32, #tpu.memory_space<vmem>>, vector<1x1x8x16xf32>
    %34 = vector.shape_cast %33 : vector<1x1x8x16xf32> to vector<8x16xf32>
    %35 = arith.truncf %34 : vector<8x16xf32> to vector<8x16xbf16>
    %c4 = arith.constant 4 : index
    %c0_37 = arith.constant 0 : index
    %c0_38 = arith.constant 0 : index
    %36 = vector.load %arg3[%c4, %c0_37, %c0_38] : memref<12x16x128xbf16, #tpu.memory_space<vmem>>, vector<1x16x128xbf16>
    %37 = vector.shape_cast %36 : vector<1x16x128xbf16> to vector<16x128xbf16>
    %cst_39 = arith.constant dense<0.000000e+00> : vector<8x128xf32>
    %38 = tpu.matmul %35, %37, %cst_39 {dimension_numbers = #tpu.dot_dimension_numbers<[1], [0], [0], [1], [0, 0, 1, 1], [], []>} : vector<8x16xbf16>, vector<16x128xbf16>, vector<8x128xf32> -> vector<8x128xf32>
    %39 = arith.addf %32, %38 : vector<8x128xf32>
    %c0_40 = arith.constant 0 : index
    %c1_41 = arith.constant 1 : index
    %c0_42 = arith.constant 0 : index
    %c32_43 = arith.constant 32 : index
    %40 = vector.load %arg2[%c0_40, %c1_41, %c0_42, %c32_43] : memref<1x3x8x128xf32, #tpu.memory_space<vmem>>, vector<1x1x8x16xf32>
    %41 = vector.shape_cast %40 : vector<1x1x8x16xf32> to vector<8x16xf32>
    %42 = arith.truncf %41 : vector<8x16xf32> to vector<8x16xbf16>
    %c5 = arith.constant 5 : index
    %c0_44 = arith.constant 0 : index
    %c0_45 = arith.constant 0 : index
    %43 = vector.load %arg3[%c5, %c0_44, %c0_45] : memref<12x16x128xbf16, #tpu.memory_space<vmem>>, vector<1x16x128xbf16>
    %44 = vector.shape_cast %43 : vector<1x16x128xbf16> to vector<16x128xbf16>
    %cst_46 = arith.constant dense<0.000000e+00> : vector<8x128xf32>
    %45 = tpu.matmul %42, %44, %cst_46 {dimension_numbers = #tpu.dot_dimension_numbers<[1], [0], [0], [1], [0, 0, 1, 1], [], []>} : vector<8x16xbf16>, vector<16x128xbf16>, vector<8x128xf32> -> vector<8x128xf32>
    %46 = arith.addf %39, %45 : vector<8x128xf32>
    %c0_47 = arith.constant 0 : index
    %c1_48 = arith.constant 1 : index
    %c0_49 = arith.constant 0 : index
    %c64_50 = arith.constant 64 : index
    %47 = vector.load %arg2[%c0_47, %c1_48, %c0_49, %c64_50] : memref<1x3x8x128xf32, #tpu.memory_space<vmem>>, vector<1x1x8x16xf32>
    %48 = vector.shape_cast %47 : vector<1x1x8x16xf32> to vector<8x16xf32>
    %49 = arith.truncf %48 : vector<8x16xf32> to vector<8x16xbf16>
    %c6 = arith.constant 6 : index
    %c0_51 = arith.constant 0 : index
    %c0_52 = arith.constant 0 : index
    %50 = vector.load %arg3[%c6, %c0_51, %c0_52] : memref<12x16x128xbf16, #tpu.memory_space<vmem>>, vector<1x16x128xbf16>
    %51 = vector.shape_cast %50 : vector<1x16x128xbf16> to vector<16x128xbf16>
    %cst_53 = arith.constant dense<0.000000e+00> : vector<8x128xf32>
    %52 = tpu.matmul %49, %51, %cst_53 {dimension_numbers = #tpu.dot_dimension_numbers<[1], [0], [0], [1], [0, 0, 1, 1], [], []>} : vector<8x16xbf16>, vector<16x128xbf16>, vector<8x128xf32> -> vector<8x128xf32>
    %53 = arith.addf %46, %52 : vector<8x128xf32>
    %c0_54 = arith.constant 0 : index
    %c1_55 = arith.constant 1 : index
    %c0_56 = arith.constant 0 : index
    %c96_57 = arith.constant 96 : index
    %54 = vector.load %arg2[%c0_54, %c1_55, %c0_56, %c96_57] : memref<1x3x8x128xf32, #tpu.memory_space<vmem>>, vector<1x1x8x16xf32>
    %55 = vector.shape_cast %54 : vector<1x1x8x16xf32> to vector<8x16xf32>
    %56 = arith.truncf %55 : vector<8x16xf32> to vector<8x16xbf16>
    %c7 = arith.constant 7 : index
    %c0_58 = arith.constant 0 : index
    %c0_59 = arith.constant 0 : index
    %57 = vector.load %arg3[%c7, %c0_58, %c0_59] : memref<12x16x128xbf16, #tpu.memory_space<vmem>>, vector<1x16x128xbf16>
    %58 = vector.shape_cast %57 : vector<1x16x128xbf16> to vector<16x128xbf16>
    %cst_60 = arith.constant dense<0.000000e+00> : vector<8x128xf32>
    %59 = tpu.matmul %56, %58, %cst_60 {dimension_numbers = #tpu.dot_dimension_numbers<[1], [0], [0], [1], [0, 0, 1, 1], [], []>} : vector<8x16xbf16>, vector<16x128xbf16>, vector<8x128xf32> -> vector<8x128xf32>
    %60 = arith.addf %53, %59 : vector<8x128xf32>
    %c0_61 = arith.constant 0 : index
    %c2_62 = arith.constant 2 : index
    %c0_63 = arith.constant 0 : index
    %c0_64 = arith.constant 0 : index
    %61 = vector.load %arg2[%c0_61, %c2_62, %c0_63, %c0_64] : memref<1x3x8x128xf32, #tpu.memory_space<vmem>>, vector<1x1x8x16xf32>
    %62 = vector.shape_cast %61 : vector<1x1x8x16xf32> to vector<8x16xf32>
    %63 = arith.truncf %62 : vector<8x16xf32> to vector<8x16xbf16>
    %c8 = arith.constant 8 : index
    %c0_65 = arith.constant 0 : index
    %c0_66 = arith.constant 0 : index
    %64 = vector.load %arg3[%c8, %c0_65, %c0_66] : memref<12x16x128xbf16, #tpu.memory_space<vmem>>, vector<1x16x128xbf16>
    %65 = vector.shape_cast %64 : vector<1x16x128xbf16> to vector<16x128xbf16>
    %cst_67 = arith.constant dense<0.000000e+00> : vector<8x128xf32>
    %66 = tpu.matmul %63, %65, %cst_67 {dimension_numbers = #tpu.dot_dimension_numbers<[1], [0], [0], [1], [0, 0, 1, 1], [], []>} : vector<8x16xbf16>, vector<16x128xbf16>, vector<8x128xf32> -> vector<8x128xf32>
    %67 = arith.addf %60, %66 : vector<8x128xf32>
    %c0_68 = arith.constant 0 : index
    %c2_69 = arith.constant 2 : index
    %c0_70 = arith.constant 0 : index
    %c32_71 = arith.constant 32 : index
    %68 = vector.load %arg2[%c0_68, %c2_69, %c0_70, %c32_71] : memref<1x3x8x128xf32, #tpu.memory_space<vmem>>, vector<1x1x8x16xf32>
    %69 = vector.shape_cast %68 : vector<1x1x8x16xf32> to vector<8x16xf32>
    %70 = arith.truncf %69 : vector<8x16xf32> to vector<8x16xbf16>
    %c9 = arith.constant 9 : index
    %c0_72 = arith.constant 0 : index
    %c0_73 = arith.constant 0 : index
    %71 = vector.load %arg3[%c9, %c0_72, %c0_73] : memref<12x16x128xbf16, #tpu.memory_space<vmem>>, vector<1x16x128xbf16>
    %72 = vector.shape_cast %71 : vector<1x16x128xbf16> to vector<16x128xbf16>
    %cst_74 = arith.constant dense<0.000000e+00> : vector<8x128xf32>
    %73 = tpu.matmul %70, %72, %cst_74 {dimension_numbers = #tpu.dot_dimension_numbers<[1], [0], [0], [1], [0, 0, 1, 1], [], []>} : vector<8x16xbf16>, vector<16x128xbf16>, vector<8x128xf32> -> vector<8x128xf32>
    %74 = arith.addf %67, %73 : vector<8x128xf32>
    %c0_75 = arith.constant 0 : index
    %c2_76 = arith.constant 2 : index
    %c0_77 = arith.constant 0 : index
    %c64_78 = arith.constant 64 : index
    %75 = vector.load %arg2[%c0_75, %c2_76, %c0_77, %c64_78] : memref<1x3x8x128xf32, #tpu.memory_space<vmem>>, vector<1x1x8x16xf32>
    %76 = vector.shape_cast %75 : vector<1x1x8x16xf32> to vector<8x16xf32>
    %77 = arith.truncf %76 : vector<8x16xf32> to vector<8x16xbf16>
    %c10 = arith.constant 10 : index
    %c0_79 = arith.constant 0 : index
    %c0_80 = arith.constant 0 : index
    %78 = vector.load %arg3[%c10, %c0_79, %c0_80] : memref<12x16x128xbf16, #tpu.memory_space<vmem>>, vector<1x16x128xbf16>
    %79 = vector.shape_cast %78 : vector<1x16x128xbf16> to vector<16x128xbf16>
    %cst_81 = arith.constant dense<0.000000e+00> : vector<8x128xf32>
    %80 = tpu.matmul %77, %79, %cst_81 {dimension_numbers = #tpu.dot_dimension_numbers<[1], [0], [0], [1], [0, 0, 1, 1], [], []>} : vector<8x16xbf16>, vector<16x128xbf16>, vector<8x128xf32> -> vector<8x128xf32>
    %81 = arith.addf %74, %80 : vector<8x128xf32>
    %c0_82 = arith.constant 0 : index
    %c2_83 = arith.constant 2 : index
    %c0_84 = arith.constant 0 : index
    %c96_85 = arith.constant 96 : index
    %82 = vector.load %arg2[%c0_82, %c2_83, %c0_84, %c96_85] : memref<1x3x8x128xf32, #tpu.memory_space<vmem>>, vector<1x1x8x16xf32>
    %83 = vector.shape_cast %82 : vector<1x1x8x16xf32> to vector<8x16xf32>
    %84 = arith.truncf %83 : vector<8x16xf32> to vector<8x16xbf16>
    %c11 = arith.constant 11 : index
    %c0_86 = arith.constant 0 : index
    %c0_87 = arith.constant 0 : index
    %85 = vector.load %arg3[%c11, %c0_86, %c0_87] : memref<12x16x128xbf16, #tpu.memory_space<vmem>>, vector<1x16x128xbf16>
    %86 = vector.shape_cast %85 : vector<1x16x128xbf16> to vector<16x128xbf16>
    %cst_88 = arith.constant dense<0.000000e+00> : vector<8x128xf32>
    %87 = tpu.matmul %84, %86, %cst_88 {dimension_numbers = #tpu.dot_dimension_numbers<[1], [0], [0], [1], [0, 0, 1, 1], [], []>} : vector<8x16xbf16>, vector<16x128xbf16>, vector<8x128xf32> -> vector<8x128xf32>
    %88 = arith.addf %81, %87 : vector<8x128xf32>
    %89 = vector.broadcast %0 : vector<1x128xf32> to vector<8x128xf32>
    %90 = arith.addf %88, %89 : vector<8x128xf32>
    %cst_89 = arith.constant dense<0.000000e+00> : vector<8x4xf32>
    %91 = tpu.matmul %90, %3, %cst_89 {dimension_numbers = #tpu.dot_dimension_numbers<[1], [1], [0], [0], [0, 0, 1, 0], [], []>} : vector<8x128xf32>, vector<4x128xf32>, vector<8x4xf32> -> vector<8x4xf32>
    %cst_90 = arith.constant 3.125000e-02 : f32
    %92 = vector.broadcast %cst_90 : f32 to vector<8x4xf32>
    %93 = arith.mulf %91, %92 : vector<8x4xf32>
    %cst_91 = arith.constant dense<0.000000e+00> : vector<8x128xf32>
    %94 = tpu.matmul %93, %3, %cst_91 {dimension_numbers = #tpu.dot_dimension_numbers<[1], [0], [0], [1], [0, 0, 1, 1], [], []>} : vector<8x4xf32>, vector<4x128xf32>, vector<8x128xf32> -> vector<8x128xf32>
    %95 = arith.subf %90, %94 : vector<8x128xf32>
    %96 = arith.mulf %95, %95 : vector<8x128xf32>
    %cst_92 = arith.constant dense<0.000000e+00> : vector<8x4xf32>
    %97 = tpu.matmul %96, %3, %cst_92 {dimension_numbers = #tpu.dot_dimension_numbers<[1], [1], [0], [0], [0, 0, 1, 0], [], []>} : vector<8x128xf32>, vector<4x128xf32>, vector<8x4xf32> -> vector<8x4xf32>
    %cst_93 = arith.constant 3.125000e-02 : f32
    %98 = vector.broadcast %cst_93 : f32 to vector<8x4xf32>
    %99 = arith.mulf %97, %98 : vector<8x4xf32>
    %cst_94 = arith.constant 9.99999974E-6 : f32
    %100 = vector.broadcast %cst_94 : f32 to vector<8x4xf32>
    %101 = arith.addf %99, %100 : vector<8x4xf32>
    %102 = math.rsqrt %101 : vector<8x4xf32>
    %cst_95 = arith.constant dense<0.000000e+00> : vector<8x128xf32>
    %103 = tpu.matmul %102, %3, %cst_95 {dimension_numbers = #tpu.dot_dimension_numbers<[1], [0], [0], [1], [0, 0, 1, 1], [], []>} : vector<8x4xf32>, vector<4x128xf32>, vector<8x128xf32> -> vector<8x128xf32>
    %104 = arith.mulf %95, %103 : vector<8x128xf32>
    %105 = vector.broadcast %1 : vector<1x128xf32> to vector<8x128xf32>
    %106 = arith.mulf %104, %105 : vector<8x128xf32>
    %107 = vector.broadcast %2 : vector<1x128xf32> to vector<8x128xf32>
    %108 = arith.addf %106, %107 : vector<8x128xf32>
    %109 = arith.truncf %108 : vector<8x128xf32> to vector<8x128xbf16>
    %c0_96 = arith.constant 0 : index
    %c0_97 = arith.constant 0 : index
    %110 = vector.load %arg6[%c0_96, %c0_97] : memref<8x256xbf16, #tpu.memory_space<vmem>>, vector<8x128xbf16>
    tpu.vector_store %arg6[%c0_96, %c0_97], %109 {strides = array<i32>} : memref<8x256xbf16, #tpu.memory_space<vmem>>, vector<8x128xbf16>,
    %cst_98 = arith.constant 0.000000e+00 : f32
    %111 = vector.broadcast %cst_98 : f32 to vector<8x128xf32>
    %c0_99 = arith.constant 0 : index
    %c0_100 = arith.constant 0 : index
    %c0_101 = arith.constant 0 : index
    %c16 = arith.constant 16 : index
    %112 = vector.load %arg2[%c0_99, %c0_100, %c0_101, %c16] : memref<1x3x8x128xf32, #tpu.memory_space<vmem>>, vector<1x1x8x16xf32>
    %113 = vector.shape_cast %112 : vector<1x1x8x16xf32> to vector<8x16xf32>
    %114 = arith.truncf %113 : vector<8x16xf32> to vector<8x16xbf16>
    %c0_102 = arith.constant 0 : index
    %c0_103 = arith.constant 0 : index
    %c0_104 = arith.constant 0 : index
    %115 = vector.load %arg3[%c0_102, %c0_103, %c0_104] : memref<12x16x128xbf16, #tpu.memory_space<vmem>>, vector<1x16x128xbf16>
    %116 = vector.shape_cast %115 : vector<1x16x128xbf16> to vector<16x128xbf16>
    %cst_105 = arith.constant dense<0.000000e+00> : vector<8x128xf32>
    %117 = tpu.matmul %114, %116, %cst_105 {dimension_numbers = #tpu.dot_dimension_numbers<[1], [0], [0], [1], [0, 0, 1, 1], [], []>} : vector<8x16xbf16>, vector<16x128xbf16>, vector<8x128xf32> -> vector<8x128xf32>
    %118 = arith.addf %111, %117 : vector<8x128xf32>
    %c0_106 = arith.constant 0 : index
    %c0_107 = arith.constant 0 : index
    %c0_108 = arith.constant 0 : index
    %c48 = arith.constant 48 : index
    %119 = vector.load %arg2[%c0_106, %c0_107, %c0_108, %c48] : memref<1x3x8x128xf32, #tpu.memory_space<vmem>>, vector<1x1x8x16xf32>
    %120 = vector.shape_cast %119 : vector<1x1x8x16xf32> to vector<8x16xf32>
    %121 = arith.truncf %120 : vector<8x16xf32> to vector<8x16xbf16>
    %c1_109 = arith.constant 1 : index
    %c0_110 = arith.constant 0 : index
    %c0_111 = arith.constant 0 : index
    %122 = vector.load %arg3[%c1_109, %c0_110, %c0_111] : memref<12x16x128xbf16, #tpu.memory_space<vmem>>, vector<1x16x128xbf16>
    %123 = vector.shape_cast %122 : vector<1x16x128xbf16> to vector<16x128xbf16>
    %cst_112 = arith.constant dense<0.000000e+00> : vector<8x128xf32>
    %124 = tpu.matmul %121, %123, %cst_112 {dimension_numbers = #tpu.dot_dimension_numbers<[1], [0], [0], [1], [0, 0, 1, 1], [], []>} : vector<8x16xbf16>, vector<16x128xbf16>, vector<8x128xf32> -> vector<8x128xf32>
    %125 = arith.addf %118, %124 : vector<8x128xf32>
    %c0_113 = arith.constant 0 : index
    %c0_114 = arith.constant 0 : index
    %c0_115 = arith.constant 0 : index
    %c80 = arith.constant 80 : index
    %126 = vector.load %arg2[%c0_113, %c0_114, %c0_115, %c80] : memref<1x3x8x128xf32, #tpu.memory_space<vmem>>, vector<1x1x8x16xf32>
    %127 = vector.shape_cast %126 : vector<1x1x8x16xf32> to vector<8x16xf32>
    %128 = arith.truncf %127 : vector<8x16xf32> to vector<8x16xbf16>
    %c2_116 = arith.constant 2 : index
    %c0_117 = arith.constant 0 : index
    %c0_118 = arith.constant 0 : index
    %129 = vector.load %arg3[%c2_116, %c0_117, %c0_118] : memref<12x16x128xbf16, #tpu.memory_space<vmem>>, vector<1x16x128xbf16>
    %130 = vector.shape_cast %129 : vector<1x16x128xbf16> to vector<16x128xbf16>
    %cst_119 = arith.constant dense<0.000000e+00> : vector<8x128xf32>
    %131 = tpu.matmul %128, %130, %cst_119 {dimension_numbers = #tpu.dot_dimension_numbers<[1], [0], [0], [1], [0, 0, 1, 1], [], []>} : vector<8x16xbf16>, vector<16x128xbf16>, vector<8x128xf32> -> vector<8x128xf32>
    %132 = arith.addf %125, %131 : vector<8x128xf32>
    %c0_120 = arith.constant 0 : index
    %c0_121 = arith.constant 0 : index
    %c0_122 = arith.constant 0 : index
    %c112 = arith.constant 112 : index
    %133 = vector.load %arg2[%c0_120, %c0_121, %c0_122, %c112] : memref<1x3x8x128xf32, #tpu.memory_space<vmem>>, vector<1x1x8x16xf32>
    %134 = vector.shape_cast %133 : vector<1x1x8x16xf32> to vector<8x16xf32>
    %135 = arith.truncf %134 : vector<8x16xf32> to vector<8x16xbf16>
    %c3_123 = arith.constant 3 : index
    %c0_124 = arith.constant 0 : index
    %c0_125 = arith.constant 0 : index
    %136 = vector.load %arg3[%c3_123, %c0_124, %c0_125] : memref<12x16x128xbf16, #tpu.memory_space<vmem>>, vector<1x16x128xbf16>
    %137 = vector.shape_cast %136 : vector<1x16x128xbf16> to vector<16x128xbf16>
    %cst_126 = arith.constant dense<0.000000e+00> : vector<8x128xf32>
    %138 = tpu.matmul %135, %137, %cst_126 {dimension_numbers = #tpu.dot_dimension_numbers<[1], [0], [0], [1], [0, 0, 1, 1], [], []>} : vector<8x16xbf16>, vector<16x128xbf16>, vector<8x128xf32> -> vector<8x128xf32>
    %139 = arith.addf %132, %138 : vector<8x128xf32>
    %c0_127 = arith.constant 0 : index
    %c1_128 = arith.constant 1 : index
    %c0_129 = arith.constant 0 : index
    %c16_130 = arith.constant 16 : index
    %140 = vector.load %arg2[%c0_127, %c1_128, %c0_129, %c16_130] : memref<1x3x8x128xf32, #tpu.memory_space<vmem>>, vector<1x1x8x16xf32>
    %141 = vector.shape_cast %140 : vector<1x1x8x16xf32> to vector<8x16xf32>
    %142 = arith.truncf %141 : vector<8x16xf32> to vector<8x16xbf16>
    %c4_131 = arith.constant 4 : index
    %c0_132 = arith.constant 0 : index
    %c0_133 = arith.constant 0 : index
    %143 = vector.load %arg3[%c4_131, %c0_132, %c0_133] : memref<12x16x128xbf16, #tpu.memory_space<vmem>>, vector<1x16x128xbf16>
    %144 = vector.shape_cast %143 : vector<1x16x128xbf16> to vector<16x128xbf16>
    %cst_134 = arith.constant dense<0.000000e+00> : vector<8x128xf32>
    %145 = tpu.matmul %142, %144, %cst_134 {dimension_numbers = #tpu.dot_dimension_numbers<[1], [0], [0], [1], [0, 0, 1, 1], [], []>} : vector<8x16xbf16>, vector<16x128xbf16>, vector<8x128xf32> -> vector<8x128xf32>
    %146 = arith.addf %139, %145 : vector<8x128xf32>
    %c0_135 = arith.constant 0 : index
    %c1_136 = arith.constant 1 : index
    %c0_137 = arith.constant 0 : index
    %c48_138 = arith.constant 48 : index
    %147 = vector.load %arg2[%c0_135, %c1_136, %c0_137, %c48_138] : memref<1x3x8x128xf32, #tpu.memory_space<vmem>>, vector<1x1x8x16xf32>
    %148 = vector.shape_cast %147 : vector<1x1x8x16xf32> to vector<8x16xf32>
    %149 = arith.truncf %148 : vector<8x16xf32> to vector<8x16xbf16>
    %c5_139 = arith.constant 5 : index
    %c0_140 = arith.constant 0 : index
    %c0_141 = arith.constant 0 : index
    %150 = vector.load %arg3[%c5_139, %c0_140, %c0_141] : memref<12x16x128xbf16, #tpu.memory_space<vmem>>, vector<1x16x128xbf16>
    %151 = vector.shape_cast %150 : vector<1x16x128xbf16> to vector<16x128xbf16>
    %cst_142 = arith.constant dense<0.000000e+00> : vector<8x128xf32>
    %152 = tpu.matmul %149, %151, %cst_142 {dimension_numbers = #tpu.dot_dimension_numbers<[1], [0], [0], [1], [0, 0, 1, 1], [], []>} : vector<8x16xbf16>, vector<16x128xbf16>, vector<8x128xf32> -> vector<8x128xf32>
    %153 = arith.addf %146, %152 : vector<8x128xf32>
    %c0_143 = arith.constant 0 : index
    %c1_144 = arith.constant 1 : index
    %c0_145 = arith.constant 0 : index
    %c80_146 = arith.constant 80 : index
    %154 = vector.load %arg2[%c0_143, %c1_144, %c0_145, %c80_146] : memref<1x3x8x128xf32, #tpu.memory_space<vmem>>, vector<1x1x8x16xf32>
    %155 = vector.shape_cast %154 : vector<1x1x8x16xf32> to vector<8x16xf32>
    %156 = arith.truncf %155 : vector<8x16xf32> to vector<8x16xbf16>
    %c6_147 = arith.constant 6 : index
    %c0_148 = arith.constant 0 : index
    %c0_149 = arith.constant 0 : index
    %157 = vector.load %arg3[%c6_147, %c0_148, %c0_149] : memref<12x16x128xbf16, #tpu.memory_space<vmem>>, vector<1x16x128xbf16>
    %158 = vector.shape_cast %157 : vector<1x16x128xbf16> to vector<16x128xbf16>
    %cst_150 = arith.constant dense<0.000000e+00> : vector<8x128xf32>
    %159 = tpu.matmul %156, %158, %cst_150 {dimension_numbers = #tpu.dot_dimension_numbers<[1], [0], [0], [1], [0, 0, 1, 1], [], []>} : vector<8x16xbf16>, vector<16x128xbf16>, vector<8x128xf32> -> vector<8x128xf32>
    %160 = arith.addf %153, %159 : vector<8x128xf32>
    %c0_151 = arith.constant 0 : index
    %c1_152 = arith.constant 1 : index
    %c0_153 = arith.constant 0 : index
    %c112_154 = arith.constant 112 : index
    %161 = vector.load %arg2[%c0_151, %c1_152, %c0_153, %c112_154] : memref<1x3x8x128xf32, #tpu.memory_space<vmem>>, vector<1x1x8x16xf32>
    %162 = vector.shape_cast %161 : vector<1x1x8x16xf32> to vector<8x16xf32>
    %163 = arith.truncf %162 : vector<8x16xf32> to vector<8x16xbf16>
    %c7_155 = arith.constant 7 : index
    %c0_156 = arith.constant 0 : index
    %c0_157 = arith.constant 0 : index
    %164 = vector.load %arg3[%c7_155, %c0_156, %c0_157] : memref<12x16x128xbf16, #tpu.memory_space<vmem>>, vector<1x16x128xbf16>
    %165 = vector.shape_cast %164 : vector<1x16x128xbf16> to vector<16x128xbf16>
    %cst_158 = arith.constant dense<0.000000e+00> : vector<8x128xf32>
    %166 = tpu.matmul %163, %165, %cst_158 {dimension_numbers = #tpu.dot_dimension_numbers<[1], [0], [0], [1], [0, 0, 1, 1], [], []>} : vector<8x16xbf16>, vector<16x128xbf16>, vector<8x128xf32> -> vector<8x128xf32>
    %167 = arith.addf %160, %166 : vector<8x128xf32>
    %c0_159 = arith.constant 0 : index
    %c2_160 = arith.constant 2 : index
    %c0_161 = arith.constant 0 : index
    %c16_162 = arith.constant 16 : index
    %168 = vector.load %arg2[%c0_159, %c2_160, %c0_161, %c16_162] : memref<1x3x8x128xf32, #tpu.memory_space<vmem>>, vector<1x1x8x16xf32>
    %169 = vector.shape_cast %168 : vector<1x1x8x16xf32> to vector<8x16xf32>
    %170 = arith.truncf %169 : vector<8x16xf32> to vector<8x16xbf16>
    %c8_163 = arith.constant 8 : index
    %c0_164 = arith.constant 0 : index
    %c0_165 = arith.constant 0 : index
    %171 = vector.load %arg3[%c8_163, %c0_164, %c0_165] : memref<12x16x128xbf16, #tpu.memory_space<vmem>>, vector<1x16x128xbf16>
    %172 = vector.shape_cast %171 : vector<1x16x128xbf16> to vector<16x128xbf16>
    %cst_166 = arith.constant dense<0.000000e+00> : vector<8x128xf32>
    %173 = tpu.matmul %170, %172, %cst_166 {dimension_numbers = #tpu.dot_dimension_numbers<[1], [0], [0], [1], [0, 0, 1, 1], [], []>} : vector<8x16xbf16>, vector<16x128xbf16>, vector<8x128xf32> -> vector<8x128xf32>
    %174 = arith.addf %167, %173 : vector<8x128xf32>
    %c0_167 = arith.constant 0 : index
    %c2_168 = arith.constant 2 : index
    %c0_169 = arith.constant 0 : index
    %c48_170 = arith.constant 48 : index
    %175 = vector.load %arg2[%c0_167, %c2_168, %c0_169, %c48_170] : memref<1x3x8x128xf32, #tpu.memory_space<vmem>>, vector<1x1x8x16xf32>
    %176 = vector.shape_cast %175 : vector<1x1x8x16xf32> to vector<8x16xf32>
    %177 = arith.truncf %176 : vector<8x16xf32> to vector<8x16xbf16>
    %c9_171 = arith.constant 9 : index
    %c0_172 = arith.constant 0 : index
    %c0_173 = arith.constant 0 : index
    %178 = vector.load %arg3[%c9_171, %c0_172, %c0_173] : memref<12x16x128xbf16, #tpu.memory_space<vmem>>, vector<1x16x128xbf16>
    %179 = vector.shape_cast %178 : vector<1x16x128xbf16> to vector<16x128xbf16>
    %cst_174 = arith.constant dense<0.000000e+00> : vector<8x128xf32>
    %180 = tpu.matmul %177, %179, %cst_174 {dimension_numbers = #tpu.dot_dimension_numbers<[1], [0], [0], [1], [0, 0, 1, 1], [], []>} : vector<8x16xbf16>, vector<16x128xbf16>, vector<8x128xf32> -> vector<8x128xf32>
    %181 = arith.addf %174, %180 : vector<8x128xf32>
    %c0_175 = arith.constant 0 : index
    %c2_176 = arith.constant 2 : index
    %c0_177 = arith.constant 0 : index
    %c80_178 = arith.constant 80 : index
    %182 = vector.load %arg2[%c0_175, %c2_176, %c0_177, %c80_178] : memref<1x3x8x128xf32, #tpu.memory_space<vmem>>, vector<1x1x8x16xf32>
    %183 = vector.shape_cast %182 : vector<1x1x8x16xf32> to vector<8x16xf32>
    %184 = arith.truncf %183 : vector<8x16xf32> to vector<8x16xbf16>
    %c10_179 = arith.constant 10 : index
    %c0_180 = arith.constant 0 : index
    %c0_181 = arith.constant 0 : index
    %185 = vector.load %arg3[%c10_179, %c0_180, %c0_181] : memref<12x16x128xbf16, #tpu.memory_space<vmem>>, vector<1x16x128xbf16>
    %186 = vector.shape_cast %185 : vector<1x16x128xbf16> to vector<16x128xbf16>
    %cst_182 = arith.constant dense<0.000000e+00> : vector<8x128xf32>
    %187 = tpu.matmul %184, %186, %cst_182 {dimension_numbers = #tpu.dot_dimension_numbers<[1], [0], [0], [1], [0, 0, 1, 1], [], []>} : vector<8x16xbf16>, vector<16x128xbf16>, vector<8x128xf32> -> vector<8x128xf32>
    %188 = arith.addf %181, %187 : vector<8x128xf32>
    %c0_183 = arith.constant 0 : index
    %c2_184 = arith.constant 2 : index
    %c0_185 = arith.constant 0 : index
    %c112_186 = arith.constant 112 : index
    %189 = vector.load %arg2[%c0_183, %c2_184, %c0_185, %c112_186] : memref<1x3x8x128xf32, #tpu.memory_space<vmem>>, vector<1x1x8x16xf32>
    %190 = vector.shape_cast %189 : vector<1x1x8x16xf32> to vector<8x16xf32>
    %191 = arith.truncf %190 : vector<8x16xf32> to vector<8x16xbf16>
    %c11_187 = arith.constant 11 : index
    %c0_188 = arith.constant 0 : index
    %c0_189 = arith.constant 0 : index
    %192 = vector.load %arg3[%c11_187, %c0_188, %c0_189] : memref<12x16x128xbf16, #tpu.memory_space<vmem>>, vector<1x16x128xbf16>
    %193 = vector.shape_cast %192 : vector<1x16x128xbf16> to vector<16x128xbf16>
    %cst_190 = arith.constant dense<0.000000e+00> : vector<8x128xf32>
    %194 = tpu.matmul %191, %193, %cst_190 {dimension_numbers = #tpu.dot_dimension_numbers<[1], [0], [0], [1], [0, 0, 1, 1], [], []>} : vector<8x16xbf16>, vector<16x128xbf16>, vector<8x128xf32> -> vector<8x128xf32>
    %195 = arith.addf %188, %194 : vector<8x128xf32>
    %196 = vector.broadcast %0 : vector<1x128xf32> to vector<8x128xf32>
    %197 = arith.addf %195, %196 : vector<8x128xf32>
    %cst_191 = arith.constant dense<0.000000e+00> : vector<8x4xf32>
    %198 = tpu.matmul %197, %3, %cst_191 {dimension_numbers = #tpu.dot_dimension_numbers<[1], [1], [0], [0], [0, 0, 1, 0], [], []>} : vector<8x128xf32>, vector<4x128xf32>, vector<8x4xf32> -> vector<8x4xf32>
    %cst_192 = arith.constant 3.125000e-02 : f32
    %199 = vector.broadcast %cst_192 : f32 to vector<8x4xf32>
    %200 = arith.mulf %198, %199 : vector<8x4xf32>
    %cst_193 = arith.constant dense<0.000000e+00> : vector<8x128xf32>
    %201 = tpu.matmul %200, %3, %cst_193 {dimension_numbers = #tpu.dot_dimension_numbers<[1], [0], [0], [1], [0, 0, 1, 1], [], []>} : vector<8x4xf32>, vector<4x128xf32>, vector<8x128xf32> -> vector<8x128xf32>
    %202 = arith.subf %197, %201 : vector<8x128xf32>
    %203 = arith.mulf %202, %202 : vector<8x128xf32>
    %cst_194 = arith.constant dense<0.000000e+00> : vector<8x4xf32>
    %204 = tpu.matmul %203, %3, %cst_194 {dimension_numbers = #tpu.dot_dimension_numbers<[1], [1], [0], [0], [0, 0, 1, 0], [], []>} : vector<8x128xf32>, vector<4x128xf32>, vector<8x4xf32> -> vector<8x4xf32>
    %cst_195 = arith.constant 3.125000e-02 : f32
    %205 = vector.broadcast %cst_195 : f32 to vector<8x4xf32>
    %206 = arith.mulf %204, %205 : vector<8x4xf32>
    %cst_196 = arith.constant 9.99999974E-6 : f32
    %207 = vector.broadcast %cst_196 : f32 to vector<8x4xf32>
    %208 = arith.addf %206, %207 : vector<8x4xf32>
    %209 = math.rsqrt %208 : vector<8x4xf32>
    %cst_197 = arith.constant dense<0.000000e+00> : vector<8x128xf32>
    %210 = tpu.matmul %209, %3, %cst_197 {dimension_numbers = #tpu.dot_dimension_numbers<[1], [0], [0], [1], [0, 0, 1, 1], [], []>} : vector<8x4xf32>, vector<4x128xf32>, vector<8x128xf32> -> vector<8x128xf32>
    %211 = arith.mulf %202, %210 : vector<8x128xf32>
    %212 = vector.broadcast %1 : vector<1x128xf32> to vector<8x128xf32>
    %213 = arith.mulf %211, %212 : vector<8x128xf32>
    %214 = vector.broadcast %2 : vector<1x128xf32> to vector<8x128xf32>
    %215 = arith.addf %213, %214 : vector<8x128xf32>
    %216 = arith.truncf %215 : vector<8x128xf32> to vector<8x128xbf16>
    %c0_198 = arith.constant 0 : index
    %c128 = arith.constant 128 : index
    %217 = vector.load %arg6[%c0_198, %c128] : memref<8x256xbf16, #tpu.memory_space<vmem>>, vector<8x128xbf16>
    tpu.vector_store %arg6[%c0_198, %c128], %216 {strides = array<i32>} : memref<8x256xbf16, #tpu.memory_space<vmem>>, vector<8x128xbf16>,
    return
  }
  func.func @transform_0(%arg0: i32, %arg1: i32) -> (i32, i32, i32, i32) {
    %c0_i32 = arith.constant 0 : i32
    %c0_i32_0 = arith.constant 0 : i32
    %c0_i32_1 = arith.constant 0 : i32
    return %arg0, %c0_i32, %arg1, %c0_i32_0 : i32, i32, i32, i32
  }
  func.func @transform_1(%arg0: i32, %arg1: i32) -> (i32, i32, i32) {
    %c0_i32 = arith.constant 0 : i32
    %c0_i32_0 = arith.constant 0 : i32
    %c0_i32_1 = arith.constant 0 : i32
    %c0_i32_2 = arith.constant 0 : i32
    return %c0_i32, %c0_i32_0, %c0_i32_1 : i32, i32, i32
  }
  func.func @transform_2(%arg0: i32, %arg1: i32) -> (i32, i32) {
    %c0_i32 = arith.constant 0 : i32
    %c0_i32_0 = arith.constant 0 : i32
    %c0_i32_1 = arith.constant 0 : i32
    return %c0_i32, %c0_i32_0 : i32, i32
  }
  func.func @transform_3(%arg0: i32, %arg1: i32) -> (i32, i32) {
    %c0_i32 = arith.constant 0 : i32
    %c0_i32_0 = arith.constant 0 : i32
    %c0_i32_1 = arith.constant 0 : i32
    return %c0_i32, %c0_i32_0 : i32, i32
  }
  func.func @transform_4(%arg0: i32, %arg1: i32) -> (i32, i32) {
    %c1_i32 = arith.constant 1 : i32
    %0 = arith.muli %arg0, %c1_i32 : i32
    %1 = arith.addi %0, %arg1 : i32
    %c0_i32 = arith.constant 0 : i32
    %c0_i32_0 = arith.constant 0 : i32
    return %1, %c0_i32 : i32, i32
  }
}

</mosaic_0001>

<bundles_post_ra>
// kernel: tpu_custom_call.1
= control target key start
LH: loop header
LB: loop body
LE: loop exit
PB: predicated region body
PF: predicated region fallthrough
CT: control target
= control target key end

     0   :  { %s2097_s0 = inlined_call_operand.hbm [shape: f32[2,3,8,128], index: 0, kind: input, shape index: {}]   ;;  %s2098_s1 = inlined_call_operand.hbm [shape: bf16[12,16,128], index: 1, kind: input, shape index: {}]   ;;  %s2099_s2 = inlined_call_operand.hbm [shape: f32[3,128], index: 2, kind: input, shape index: {}]   ;;  %s2100_s3 = inlined_call_operand.hbm [shape: f32[4,128], index: 3, kind: input, shape index: {}]   ;;  %s2101_s4 = inlined_call_operand.hbm [shape: bf16[16,256], index: 4, kind: output, shape index: {}]  }
   0x1   :  { %2102 = sst [smem:[#allocation15_spill]] %s2098_s1 }
   0x2   :  { %9 = vsyncpa [#allocation3], 0 }
   0x3   :  { %11 = vsyncpa [#allocation3 + $0x1], 0 }
   0x4   :  { %12 = vsyncpa [#allocation6], 0 }
   0x5   :  { %13 = vsyncpa [#allocation9], 0 }
   0x6   :  { %14 = vsyncpa [#allocation4], 0 }
   0x7   :  { %16 = vsyncpa [#allocation4 + $0x1], 0  ;;  %s1847_s15 = smov 0   ;;  %s1849_s16 = smov 0  }
   0x8   :  { %s1851_s17 = smov 0   ;;  %s1853_s18 = smov 0  }
   0x9   :  { %s1855_s19 = smov 0   ;;  %s1857_s20 = smov 0  }
   0xa LB: > { %s1307_s21 = sadd.s32 4294967295, %s1806_s20   ;;  %s1308_s22 = sadd.s32 4294967294, %s1806_s20   ;;  %s1806_s20 = sphi %s1857_s20, %s22_s20   ;;  %s1802_s19 = sphi %s1855_s19, %s2115_s19   ;;  %s1798_s18 = sphi %s1853_s18, %s2114_s18   ;;  %s1794_s17 = sphi %s1851_s17, %s2113_s17   ;;  %s1790_s16 = sphi %s1849_s16, %s2112_s16   ;;  %s1786_s15 = sphi %s1847_s15, %s2111_s15  }
   0xb   : > { %p56_p0 = scmp.ne.s32.totalorder %s1790_s16, %s1786_s15  ;;  %p1881_p1 = scmp.eq.s32.totalorder %s1307_s21, 0 }
   0xc   : > { %p1885_p2 = scmp.eq.s32.totalorder %s1307_s21, 1  ;;  %p151_p3 = scmp.eq.s32.totalorder %s1308_s22, 1 }
   0xd   : > { %p1891_p4 = por %p1881_p1, %p56_p0  ;;  %p1309_p5 = scmp.ge.s32.totalorder %s1806_s20, 1 }
   0xe   : > { %p1896_p6 = por %p151_p3, %p56_p0  ;;  %p158_p7 = scmp.lt.s32.totalorder %s1806_s20, 3 }
   0xf   : > { %s2107_s1 = sld [smem:[#allocation15_spill]]  ;;  %s1808_s5 = smov [#allocation5]  }
  0x10   : > { %p1904_p8 = pnand %p1309_p5, %p158_p7  ;;  %s171_s6 = sshll.u32 %s1808_s5, 4  ;;  %s172_s6 = int_to_ptr.vmem [resolvable:$true] %s171_s6 }
  0x11   : > { %p1313_p11 = scmp.ge.s32.totalorder %s1806_s20, 2  ;;  %s184_s10 = sshll.u32 %s2099_s2, 4  ;;  %s185_s10 = int_to_ptr.hbm [resolvable:$true] %s184_s10 }
  0x12   : > { %p1501_p9 = pneg %p1904_p8  ;;  %s1809_s11 = smov 64  }
  0x13   : > { %s1810_s12 = smov 4   ;;  %s1811_s13 = smov [#allocation7]  }
  0x14   : > { %p1912_p10 = pnand %p1501_p9, %p1881_p1  ;;  %s186_s14 = sshll.u32 %s1811_s13, 4  ;;  %s187_s14 = int_to_ptr.vmem [resolvable:$true] %s186_s14 }
  0x15   : > { %s169_s29 = sshll.u32 %s2107_s1, 4  ;;  %s196_s27 = sshll.u32 %s2100_s3, 4  ;;  %s170_s29 = int_to_ptr.hbm [resolvable:$true] %s169_s29  ;;  %s197_s27 = int_to_ptr.hbm [resolvable:$true] %s196_s27 }
  0x16   : > { %1504 = dma.hbm_to_vmem [thread:$0]  (!%p1912_p10), %s170_s29, 1536, %s172_s6, [#allocation6], %s1809_s11, %s1809_s11, %s1810_s12  }
  0x17   : > { %1507 = dma.hbm_to_vmem [thread:$0]  (!%p1912_p10), %s185_s10, 64, %s187_s14, [#allocation6]  }
  0x18   : > { %s1812_s28 = smov [#allocation8]   ;;  %s34_s29 = sadd.s32 1, %s1802_s19 }
  0x19   : > { %s198_s5 = sshll.u32 %s1812_s28, 4  ;;  %p36_p12 = scmp.ge.s32.totalorder %s34_s29, 2  ;;  %s199_s5 = int_to_ptr.vmem [resolvable:$true] %s198_s5 }
  0x1a   : > { %1510 = dma.hbm_to_vmem [thread:$0]  (!%p1912_p10), %s197_s27, 64, %s199_s5, [#allocation9]  }
  0x1b   : > { %s43_s6 = sadd.s32 1, %s1794_s17  ;;  %p50_p13 = scmp.ne.s32.totalorder %s1794_s17, %s1790_s16 }
  0x1c   : > { %p51_p0 = scmp.eq.s32.totalorder %s1806_s20, 0  ;;  %s2117_s29 = smov (%p36_p12, %s34_s29), 0 }
  0x1d   : > { %p1938_p5 = por %p1885_p2, %p50_p13  ;;  %s38_s9 = ssub.s32 %s1802_s19, %s2117_s29 }
  0x1e   : > { %p52_p3 = por %p51_p0, %p50_p13  ;;  %p1522_p7 = scmp.lt.s32.totalorder %s1806_s20, 2 }
  0x1f   : > { %p41_p9 = scmp.eq.s32.totalorder %s38_s9, 0  ;;  %s209_s7 = sand.u32 1, %s1794_s17  }
  0x20   : > { %s1482_s10 = smul.u32 24, %s209_s7  ;;  %p1512_p10 = pnand %p1522_p7, %p52_p3 }
  0x21   : > { %s1947_s11 = scalar_select %p41_p9, %s1794_s17, %s43_s6  }
  0x22   : > { %s1483_s12 = smul.u32 24, %s1802_s19  ;;  %s213_s13 = scalar_lea.vmem [#allocation2], %s1482_s10 }
  0x23   : > { %s222_s14 = sshll.u32 %s213_s13, 4  ;;  %s210_s28 = scalar_lea.sflag [#allocation3], %s209_s7  ;;  %s223_s14 = int_to_ptr.vmem [resolvable:$true] %s222_s14 }
  0x24   : > { %s219_s27 = scalar_lea.hbm %s2097_s0, %s1483_s12  ;;  %s1813_s5 = smov 128  }
  0x25   : > { %s220_s24 = sshll.u32 %s219_s27, 4  ;;  %s1814_s1 = smov 8   ;;  %s221_s24 = int_to_ptr.hbm [resolvable:$true] %s220_s24 }
  0x26   : > { %1514 = dma.hbm_to_vmem [thread:$0]  (!%p1512_p10), %s221_s24, 384, %s223_s14, %s210_s28, %s1813_s5, %s1813_s5, %s1814_s1  }
  0x27   : > { %234 = sbr.rel (%p1904_p8) target bundleno = 1486 (0x5ce), region = 36  ;;  %s1956_s6 = sand.u32 (!%p1904_p8), 1, %s1790_s16  }
  0x28   : > { %s1484_s9 = smul.u32 (!%p1904_p8), 24, %s1956_s6  ;;  %s237_s10 = scalar_lea.sflag (!%p1904_p8), [#allocation3], %s1956_s6 }
  0x2a   : > { %s240_s13 = scalar_lea.vmem (!%p1904_p8), [#allocation2], %s1484_s9 }
  0x2c   : > { %1769 = dma.done.wait (%p1891_p4), %s237_s10, 384  }
  0x2d   : > { %1771 = vsyncadd (%p1891_p4), %s237_s10, 4294966912 }
  0x2e   : > { %1773 = dma.done.wait (%p1881_p1), [#allocation6], 1600  }
  0x2f   : > { %1775 = vsyncadd (%p1881_p1), [#allocation6], 4294965696 }
  0x30   : > { %1777 = dma.done.wait (%p1881_p1), [#allocation9], 64  }
  0x31   : > { %1779 = vsyncadd (%p1881_p1), [#allocation9], 4294967232  ;;  %v287_v0 = vld [vmem:[%s240_s13] sm:$0xff]  ;;  %v1340_v1 = vld [vmem:[%s240_s13 + $0x8] sm:$0xff]  ;;  %s1815_s1 = smov 32   ;;  %s1816_s25 = smov 64  }
  0x32   : > { %v1972_v2 = vpack.c.bf16 %v287_v0, %v287_v0  ;;  %v1459_v3 = vld [vmem:[#allocation5 + $0x10] sm:$0xff]  ;;  %v1460_v4 = vld [vmem:[#allocation5 + $0x18] sm:$0xff]  ;;  %v1457_v5 = vld [vmem:[#allocation5] sm:$0xff]  ;;  %v1974_v6 = vpack.c.bf16 %v1340_v1, %v1340_v1  ;;  %s1817_s23 = smov 96   ;;  %vm303_vm0 = vcmask 130048   ;;  %vm653_vm1 = vcmask 1043456  }
  0x33   : > { %363 = vmatpush.bf16.msra.mxu2 %v1459_v3  ;;  %391 = vmatpush.bf16.msra.mxu3 %v1460_v4  ;;  %v1361_v7 = vld [vmem:[%s240_s13 + $0x10] sm:$0xff]  ;;  %v1458_v9 = vld [vmem:[#allocation5 + $0x8] sm:$0xff]  ;;  %v1463_v10 = vld [vmem:[#allocation5 + $0x30] sm:$0xff]  ;;  %vm649_vm2 = vcmask 31744   ;;  %s1818_s30 = smov 48   ;;  %s1819_s7 = smov 80  }
  0x34   : > { %373 = vrot.lane.b32.xlu1 %v1972_v2, %s1815_s1  ;;  %345 = vrot.lane.b32.xlu0 %v1972_v2, %s1816_s25  ;;  %v1982_v8 = vpack.c.bf16 %v1361_v7, %v1361_v7  ;;  %v1461_v11 = vld [vmem:[#allocation5 + $0x20] sm:$0xff]  ;;  %v1464_v12 = vld [vmem:[#allocation5 + $0x38] sm:$0xff]  ;;  %v1462_v14 = vld [vmem:[#allocation5 + $0x28] sm:$0xff]  ;;  %s1820_s12 = smov 16   ;;  %s1821_s14 = smov 112  }
  0x35   : > { %487 = vrot.lane.b32.xlu2 %v1974_v6, %s1815_s1  ;;  %336 = vmatpush.bf16.msra.mxu1 %v1457_v5  ;;  %v1466_v16 = vld [vmem:[#allocation5 + $0x48] sm:$0xff]  ;;  %v1467_v17 = vld [vmem:[#allocation5 + $0x50] sm:$0xff]  ;;  %v1468_v18 = vld [vmem:[#allocation5 + $0x58] sm:$0xff]  ;;  %s1319_s21 = sshll.u32 %s1956_s6, 3  ;;  %s1481_s27 = sshll.u32 %s1798_s18, 3 }
  0x36   : > { %314 = vmatpush.bf16.msra.mxu0 %v1458_v9  ;;  %v1465_v22 = vld [vmem:[#allocation5 + $0x40] sm:$0xff]  ;;  %v1471_v7 = vld [vmem:[#allocation5 + $0x10] sm:$0xff]  ;;  %s2051_s22 = scalar_lea.vmem [#allocation10], %s1319_s21  ;;  %s1192_s5 = scalar_lea.hbm %s2101_s4, %s1481_s27 }
  0x37   : > { %477 = vmatpush.bf16.msrb.mxu2 %v1463_v10  ;;  %505 = vmatpush.bf16.msrb.mxu3 %v1464_v12  ;;  %v2002_v31 = vld [vmem:[#allocation8] sm:$0xf]  ;;  %v2010_v59 = vld [vmem:[#allocation7] ss:$0 sm:$0xff]  ;;  %v1475_v12 = vld [vmem:[#allocation5 + $0x30] sm:$0xff]  ;;  %s1194_s9 = sshll.u32 %s2051_s22, 4  ;;  %s1195_s9 = int_to_ptr.vmem [resolvable:$true] %s1194_s9 }
  0x38   : > { %1329 = vmatmul.msk.bf16.vlgmr.msra.gmra.mxu1 %vm303_vm0, %v1972_v2  ;;  %v1469_v10 = vld [vmem:[#allocation5] sm:$0xff]  ;;  %s1196_s10 = sshll.u32 %s1192_s5, 4  ;;  %s1180_s13 = scalar_lea.sflag [#allocation4], %s1956_s6  ;;  %s1197_s10 = int_to_ptr.hbm [resolvable:$true] %s1196_s10 }
  0x39   : > { %449 = vmatpush.bf16.msrb.mxu1 %v1462_v14 }
  0x3a   : > { %420 = vmatpush.bf16.msrb.mxu0 %v1461_v11 }
  0x3c   : > { %295 = vrot.lane.b32.xlu0 %v1972_v2, %s1817_s23  ;;  %459 = vrot.lane.b32.xlu1 %v1974_v6, %s1816_s25 }
  0x3d   : > { %431 = vrot.lane.b32.xlu2 %v1974_v6, %s1817_s23  ;;  %563 = vmatpush.bf16.msra.mxu1 %v1466_v16 }
  0x44   : > { %601 = vrot.lane.b32.xlu1 %v1982_v8, %s1815_s1  ;;  %573 = vrot.lane.b32.xlu0 %v1982_v8, %s1816_s25  ;;  %s1730_s1 = sshra.s32 %s1197_s10, 4  ;;  %s1731_s1 = int_to_ptr.hbm [resolvable:$true] %s1730_s1 }
  0x45   : > { %545 = vrot.lane.b32.xlu2 %v1982_v8, %s1817_s23  ;;  %s1732_s25 = scalar_lea.hbm %s1731_s1, 8  ;;  %p1737_p8 = scmp.lt.s32.totalorder %s1731_s1, %s2101_s4 }
  0x46   : > { %p1733_p1 = scmp.ne.s32.totalorder %s1731_s1, %s1732_s25 }
  0x48   : > { %p1734_p2 = pnand %p1733_p1, %p1938_p5 }
  0x4a   : > { %p1735_p4 = pneg %p1734_p2 }
  0x4c   : > { %798 = vrot.lane.b32.xlu0 %v1972_v2, %s1818_s30  ;;  %748 = vrot.lane.b32.xlu1 %v1972_v2, %s1819_s7 }
  0x4d   : > { %825 = vrot.lane.b32.xlu2 %v1972_v2, %s1820_s12 }
  0x54   : > { %772 = vrot.lane.b32.xlu0 %v1972_v2, %s1821_s14  ;;  %909 = vrot.lane.b32.xlu1 %v1974_v6, %s1818_s30 }
  0x55   : > { %855 = vrot.lane.b32.xlu2 %v1974_v6, %s1821_s14 }
  0x5c   : > { %882 = vrot.lane.b32.xlu1 %v1974_v6, %s1819_s7  ;;  %936 = vrot.lane.b32.xlu0 %v1974_v6, %s1820_s12 }
  0x5d   : > { %1020 = vrot.lane.b32.xlu2 %v1982_v8, %s1818_s30  ;;  %s1736_s30 = scalar_lea.hbm %s2101_s4, 16 }
  0x5e   : > { %p1738_p12 = scmp.lt.s32.totalorder %s1736_s30, %s1732_s25 }
  0x60   : > { %p1739_p13 = por %p1738_p12, %p1737_p8 }
  0x62   : > { %p1740_p0 = pnand %p1739_p13, %p1735_p4 }
  0x64   : > { %966 = vrot.lane.b32.xlu0 %v1982_v8, %s1821_s14  ;;  %1047 = vrot.lane.b32.xlu1 %v1982_v8, %s1820_s12 }
  0x65   : > { %993 = vrot.lane.b32.xlu2 %v1982_v8, %s1819_s7 }
  0x8f   : > { %v488_v13 = vpop.permute.xlu2 %487 }
  0x97   : > { %v432_v15 = vpop.permute.xlu2 %431 }
  0x98   : > { %1350 = vmatmul.msk.bf16.vlgmr.msrb.gmra.mxu1 %vm303_vm0, %v432_v15  ;;  %v1473_v15 = vld [vmem:[#allocation5 + $0x20] sm:$0xff] }
  0x99   : > { %1382 = vmatpush.msk.msrb.mxu1 %vm653_vm1, %v2002_v31 }
  0x9f   : > { %v546_v21 = vpop.permute.xlu2 %545 }
  0xa6   : > { %v374_v19 = vpop.permute.xlu1 %373  ;;  %v346_v20 = vpop.permute.xlu0 %345 }
  0xa7   : > { %1334 = vmatmul.msk.bf16.vlgmr.msra.gmra.mxu2 %vm303_vm0, %v346_v20  ;;  %1339 = vmatmul.msk.bf16.vlgmr.msra.gmra.mxu3 %vm303_vm0, %v374_v19  ;;  %v826_v14 = vpop.permute.xlu2 %825  ;;  %v1479_v19 = vld [vmem:[#allocation5 + $0x50] sm:$0xff] }
  0xa8   : > { %591 = vmatpush.bf16.msra.mxu2 %v1467_v17  ;;  %619 = vmatpush.bf16.msra.mxu3 %v1468_v18  ;;  %v1474_v17 = vld [vmem:[#allocation5 + $0x28] sm:$0xff] }
  0xa9   : > { %1371 = vmatmul.msk.bf16.vlgmr.msra.gmra.mxu1 %vm303_vm0, %v546_v21 }
  0xaa   : > { %790 = vmatpush.bf16.msra.mxu1 %v1469_v10 }
  0xae   : > { %v296_v23 = vpop.permute.xlu0 %295  ;;  %v460_v24 = vpop.permute.xlu1 %459 }
  0xaf   : > { %1324 = vmatmul.msk.bf16.vlgmr.msra.gmra.mxu0 %vm303_vm0, %v296_v23 }
  0xb0   : > { %534 = vmatpush.bf16.msra.mxu0 %v1465_v22  ;;  %v856_v22 = vpop.permute.xlu2 %855 }
  0xb5   : > { %v338_v27 = vpop.f32.mrf.mxu1 }
  0xb6   : > { %v602_v25 = vpop.permute.xlu1 %601  ;;  %v574_v26 = vpop.permute.xlu0 %573 }
  0xb7   : > { %1355 = vmatmul.msk.bf16.vlgmr.msrb.gmra.mxu2 %vm303_vm0, %v460_v24  ;;  %1360 = vmatmul.msk.bf16.vlgmr.msrb.gmra.mxu3 %vm303_vm0, %v488_v13 }
  0xb8   : > { %694 = vmatpush.xpose.msrb.mxu2 %v2002_v31  ;;  %1384 = vmatpush.msk.msrb.mxu3 %vm653_vm1, %v2002_v31 }
  0xbd   : > { %v340_v28 = vpop.f32.mrf.mxu1 }
  0xbe   : > { %v799_v9 = vpop.permute.xlu0 %798  ;;  %v749_v11 = vpop.permute.xlu1 %748  ;;  %v1477_v28 = vld [vmem:[#allocation5 + $0x40] sm:$0xff] }
  0xbf   : > { %1345 = vmatmul.msk.bf16.vlgmr.msrb.gmra.mxu0 %vm303_vm0, %v1974_v6  ;;  %v1470_v6 = vld [vmem:[#allocation5 + $0x8] sm:$0xff] }
  0xc0   : > { %643 = vmatpush.xpose.msrb.mxu0 %v2002_v31 }
  0xc6   : > { %v773_v13 = vpop.permute.xlu0 %772  ;;  %v910_v16 = vpop.permute.xlu1 %909 }
  0xc7   : > { %1376 = vmatmul.msk.bf16.vlgmr.msra.gmra.mxu2 %vm303_vm0, %v574_v26  ;;  %1381 = vmatmul.msk.bf16.vlgmr.msra.gmra.mxu3 %vm303_vm0, %v602_v25 }
  0xc8   : > { %816 = vmatpush.bf16.msra.mxu2 %v1471_v7 }
  0xce   : > { %v883_v23 = vpop.permute.xlu1 %882  ;;  %v937_v24 = vpop.permute.xlu0 %936 }
  0xcf   : > { %1366 = vmatmul.msk.bf16.vlgmr.msra.gmra.mxu0 %vm303_vm0, %v1982_v8  ;;  %v1472_v8 = vld [vmem:[#allocation5 + $0x18] sm:$0xff] }
  0xd0   : > { %766 = vmatpush.bf16.msra.mxu0 %v1470_v6  ;;  %843 = vmatpush.bf16.msra.mxu3 %v1472_v8 }
 0x115   : > { %v451_v29 = vpop.f32.mrf.mxu1 }
 0x11d   : > { %v453_v30 = vpop.f32.mrf.mxu1 }
 0x11e   : > { %v1478_v30 = vld [vmem:[#allocation5 + $0x48] sm:$0xff] }
 0x126   : > { %v565_v32 = vpop.f32.mrf.mxu1 }
 0x12a   : > { %v365_v33 = vpop.f32.mrf.mxu2  ;;  %v393_v34 = vpop.f32.mrf.mxu3 }
 0x12c   : > { %v316_v35 = vpop.f32.mrf.mxu0 }
 0x12d   : > { %v339_v40 = vadd.f32 %v338_v27, %v316_v35  ;;  %v1476_v35 = vld [vmem:[#allocation5 + $0x38] sm:$0xff] }
 0x12e   : > { %v567_v36 = vpop.f32.mrf.mxu1 }
 0x12f   : > { %v369_v41 = vadd.f32 %v365_v33, %v339_v40  ;;  %v967_v36 = vpop.permute.xlu0 %966  ;;  %v1048_v40 = vpop.permute.xlu1 %1047 }
 0x131   : > { %v397_v45 = vadd.f32 %v393_v34, %v369_v41 }
 0x132   : > { %v367_v37 = vpop.f32.mrf.mxu2  ;;  %v395_v38 = vpop.f32.mrf.mxu3 }
 0x134   : > { %v318_v39 = vpop.f32.mrf.mxu0 }
 0x135   : > { %v1480_v39 = vld [vmem:[#allocation5 + $0x58] sm:$0xff] }
 0x13a   : > { %v479_v42 = vpop.f32.mrf.mxu2  ;;  %v507_v43 = vpop.f32.mrf.mxu3 }
 0x13c   : > { %v422_v44 = vpop.f32.mrf.mxu0 }
 0x13d   : > { %v426_v46 = vadd.f32 %v422_v44, %v397_v45 }
 0x13f   : > { %v455_v49 = vadd.f32 %v451_v29, %v426_v46  ;;  %v1021_v29 = vpop.permute.xlu2 %1020 }
 0x141   : > { %v483_v51 = vadd.f32 %v479_v42, %v455_v49 }
 0x142   : > { %v481_v47 = vpop.f32.mrf.mxu2  ;;  %v509_v48 = vpop.f32.mrf.mxu3 }
 0x143   : > { %v511_v54 = vadd.f32 %v507_v43, %v483_v51 }
 0x144   : > { %v424_v50 = vpop.f32.mrf.mxu0 }
 0x147   : > { %v994_v38 = vpop.permute.xlu2 %993 }
 0x14a   : > { %v593_v52 = vpop.f32.mrf.mxu2  ;;  %v621_v53 = vpop.f32.mrf.mxu3 }
 0x14c   : > { %v536_v55 = vpop.f32.mrf.mxu0 }
 0x14d   : > { %v540_v56 = vadd.f32 %v536_v55, %v511_v54 }
 0x14f   : > { %v569_v57 = vadd.f32 %v565_v32, %v540_v56 }
 0x151   : > { %v597_v58 = vadd.f32 %v593_v52, %v569_v57 }
 0x152   : > { %v595_v60 = vpop.f32.mrf.mxu2  ;;  %v623_v61 = vpop.f32.mrf.mxu3 }
 0x153   : > { %v625_v62 = vadd.f32 %v621_v53, %v597_v58  ;;  %v1591_v58 = vld [vmem:[#allocation7 + $0x2] ss:$0 sm:$0xff] }
 0x154   : > { %v538_v63 = vpop.f32.mrf.mxu0 }
 0x155   : > { %v627_v0 = vadd.f32 %v2010_v59, %v625_v62 }
 0x157   : > { %644 = vmatmul.f32.vlgmr.msrb.gmra.mxu0 %v627_v0 }
 0x158   : > { %873 = vmatpush.bf16.msrb.mxu0 %v1473_v15 }
 0x15f   : > { %1390 = vmatmul.msk.bf16.vlgmr.msra.gmra.mxu0 %vm303_vm0, %v749_v11 }
 0x160   : > { %984 = vmatpush.bf16.msra.mxu0 %v1477_v28 }
 0x16f   : > { %1411 = vmatmul.msk.bf16.vlgmr.msrb.gmra.mxu0 %vm303_vm0, %v856_v22 }
 0x170   : > { %1088 = vmatpush.xpose.msrb.mxu0 %v2002_v31 }
 0x17f   : > { %1432 = vmatmul.msk.bf16.vlgmr.msra.gmra.mxu0 %vm303_vm0, %v967_v36 }
 0x1d4   : > { %v645_v1 = vpop.f32.mrf.mxu0 }
 0x1d5   : > { %v648_v3 = vmul.f32 0.03125, %v645_v1 }
 0x1d7   : > { %1383 = vmatmul.msk.f32.vlgmr.msrb.gmra.mxu1 %vm649_vm2, %v648_v3 }
 0x1d8   : > { %900 = vmatpush.bf16.msrb.mxu1 %v1474_v17 }
 0x1dc   : > { %v768_v41 = vpop.f32.mrf.mxu0 }
 0x1df   : > { %1395 = vmatmul.msk.bf16.vlgmr.msra.gmra.mxu1 %vm303_vm0, %v773_v13 }
 0x1e0   : > { %1011 = vmatpush.bf16.msra.mxu1 %v1478_v30 }
 0x1e4   : > { %v770_v44 = vpop.f32.mrf.mxu0 }
 0x1ec   : > { %v875_v47 = vpop.f32.mrf.mxu0 }
 0x1ef   : > { %1416 = vmatmul.msk.bf16.vlgmr.msrb.gmra.mxu1 %vm303_vm0, %v883_v23 }
 0x1f0   : > { %1448 = vmatpush.msk.msrb.mxu1 %vm653_vm1, %v2002_v31 }
 0x1f4   : > { %v877_v50 = vpop.f32.mrf.mxu0 }
 0x1fc   : > { %v986_v53 = vpop.f32.mrf.mxu0 }
 0x1ff   : > { %1437 = vmatmul.msk.bf16.vlgmr.msra.gmra.mxu1 %vm303_vm0, %v994_v38 }
 0x204   : > { %v988_v60 = vpop.f32.mrf.mxu0 }
 0x254   : > { %v674_v4 = vpop.f32.mrf.mxu1 }
 0x255   : > { %v2026_v5 = vsub.f32 %v627_v0, %v674_v4 }
 0x257   : > { %v678_v2 = vmul.f32 %v2026_v5, %v2026_v5 }
 0x259   : > { %695 = vmatmul.f32.vlgmr.msrb.gmra.mxu2 %v678_v2 }
 0x25a   : > { %927 = vmatpush.bf16.msrb.mxu2 %v1475_v12 }
 0x25c   : > { %v792_v43 = vpop.f32.mrf.mxu1 }
 0x25d   : > { %v793_v1 = vadd.f32 %v792_v43, %v768_v41 }
 0x261   : > { %1400 = vmatmul.msk.bf16.vlgmr.msra.gmra.mxu2 %vm303_vm0, %v799_v9 }
 0x262   : > { %1038 = vmatpush.bf16.msra.mxu2 %v1479_v19 }
 0x264   : > { %v794_v46 = vpop.f32.mrf.mxu1 }
 0x26c   : > { %v902_v49 = vpop.f32.mrf.mxu1 }
 0x271   : > { %1421 = vmatmul.msk.bf16.vlgmr.msrb.gmra.mxu2 %vm303_vm0, %v910_v16 }
 0x272   : > { %1134 = vmatpush.xpose.msrb.mxu2 %v2002_v31 }
 0x274   : > { %v904_v52 = vpop.f32.mrf.mxu1 }
 0x27c   : > { %v1013_v55 = vpop.f32.mrf.mxu1 }
 0x281   : > { %1442 = vmatmul.msk.bf16.vlgmr.msra.gmra.mxu2 %vm303_vm0, %v1021_v29 }
 0x284   : > { %v1015_v63 = vpop.f32.mrf.mxu1 }
 0x2dc   : > { %v696_v18 = vpop.f32.mrf.mxu2 }
 0x2dd   : > { %v699_v20 = vmul.f32 0.03125, %v696_v18 }
 0x2df   : > { %v700_v21 = vadd.f32 1e-05, %v699_v20 }
 0x2e1   : > { %1592 = vrsqrt.f32 %v700_v21  ;;  %vm707_vm4 = vweird.f32 %v700_v21 }
 0x2e4   : > { %v818_v42 = vpop.f32.mrf.mxu2 }
 0x2e5   : > { %v822_v2 = vadd.f32 %v818_v42, %v793_v1 }
 0x2e7   : > { %v1593_v25 = vpop.eup %1592 }
 0x2e8   : > { %v702_v26 = vmul.f32 %v1593_v25, %v700_v21  ;;  %vm708_vm3 = vweird.f32 %v1593_v25 }
 0x2e9   : > { %vm709_vm5 = vmor %vm707_vm4, %vm708_vm3 }
 0x2ea   : > { %v703_v27 = vmul.f32 %v1593_v25, %v702_v26 }
 0x2ec   : > { %v704_v32 = vmul.f32 0.5, %v703_v27  ;;  %v820_v45 = vpop.f32.mrf.mxu2 }
 0x2ee   : > { %v705_v33 = vsub.f32 1.5, %v704_v32 }
 0x2f0   : > { %v706_v34 = vmul.f32 %v1593_v25, %v705_v33 }
 0x2f2   : > { %v710_v37 = vsel %vm709_vm5, %v1593_v25, %v706_v34 }
 0x2f3   : > { %1385 = vmatmul.msk.f32.vlgmr.msrb.gmra.mxu3 %vm649_vm2, %v710_v37 }
 0x2f4   : > { %954 = vmatpush.bf16.msrb.mxu3 %v1476_v35  ;;  %v929_v48 = vpop.f32.mrf.mxu2 }
 0x2fb   : > { %1405 = vmatmul.msk.bf16.vlgmr.msra.gmra.mxu3 %vm303_vm0, %v826_v14 }
 0x2fc   : > { %1065 = vmatpush.bf16.msra.mxu3 %v1480_v39  ;;  %v931_v51 = vpop.f32.mrf.mxu2 }
 0x304   : > { %v1040_v54 = vpop.f32.mrf.mxu2 }
 0x30b   : > { %1426 = vmatmul.msk.bf16.vlgmr.msrb.gmra.mxu3 %vm303_vm0, %v937_v24 }
 0x30c   : > { %1450 = vmatpush.msk.msrb.mxu3 %vm653_vm1, %v2002_v31  ;;  %v1590_v31 = vld [vmem:[#allocation7 + $0x1] ss:$0 sm:$0xff]  ;;  %v1042_v62 = vpop.f32.mrf.mxu2 }
 0x31b   : > { %1447 = vmatmul.msk.bf16.vlgmr.msra.gmra.mxu3 %vm303_vm0, %v1048_v40 }
 0x376   : > { %v731_v56 = vpop.f32.mrf.mxu3 }
 0x377   : > { %v734_v57 = vmul.f32 %v731_v56, %v2026_v5 }
 0x379   : > { %v736_v61 = vmul.f32 %v1590_v31, %v734_v57 }
 0x37b   : > { %v738_v0 = vadd.f32 %v1591_v58, %v736_v61 }
 0x37d   : > { %v739_v3 = vpack.c.bf16 %v738_v0, %v738_v0 }
 0x37e   : > { %v845_v4 = vpop.f32.mrf.mxu3 }
 0x37f   : > { %740 = vst [vmem:[%s2051_s22] sm:$0xf] %v739_v3  ;;  %v849_v7 = vadd.f32 %v845_v4, %v822_v2 }
 0x381   : > { %v879_v6 = vadd.f32 %v875_v47, %v849_v7 }
 0x383   : > { %v906_v10 = vadd.f32 %v902_v49, %v879_v6 }
 0x385   : > { %v933_v11 = vadd.f32 %v929_v48, %v906_v10 }
 0x386   : > { %v847_v9 = vpop.f32.mrf.mxu3 }
 0x38e   : > { %v956_v5 = vpop.f32.mrf.mxu3 }
 0x38f   : > { %v960_v8 = vadd.f32 %v956_v5, %v933_v11 }
 0x391   : > { %v990_v12 = vadd.f32 %v986_v53, %v960_v8 }
 0x393   : > { %v1017_v14 = vadd.f32 %v1013_v55, %v990_v12 }
 0x395   : > { %v1044_v15 = vadd.f32 %v1040_v54, %v1017_v14 }
 0x396   : > { %v958_v13 = vpop.f32.mrf.mxu3 }
 0x39e   : > { %v1067_v16 = vpop.f32.mrf.mxu3 }
 0x39f   : > { %v1071_v17 = vadd.f32 %v1067_v16, %v1044_v15 }
 0x3a1   : > { %v1072_v18 = vadd.f32 %v2010_v59, %v1071_v17 }
 0x3a3   : > { %1089 = vmatmul.f32.vlgmr.msrb.gmra.mxu0 %v1072_v18 }
 0x3a6   : > { %v1069_v19 = vpop.f32.mrf.mxu3 }
 0x420   : > { %v1090_v20 = vpop.f32.mrf.mxu0 }
 0x421   : > { %v1093_v21 = vmul.f32 0.03125, %v1090_v20 }
 0x423   : > { %1449 = vmatmul.msk.f32.vlgmr.msrb.gmra.mxu1 %vm649_vm2, %v1093_v21 }
 0x4a0   : > { %v1114_v22 = vpop.f32.mrf.mxu1 }
 0x4a1   : > { %v1117_v23 = vsub.f32 %v1072_v18, %v1114_v22 }
 0x4a3   : > { %v1118_v24 = vmul.f32 %v1117_v23, %v1117_v23 }
 0x4a5   : > { %1135 = vmatmul.f32.vlgmr.msrb.gmra.mxu2 %v1118_v24 }
 0x528   : > { %v1136_v25 = vpop.f32.mrf.mxu2 }
 0x529   : > { %v1139_v26 = vmul.f32 0.03125, %v1136_v25 }
 0x52b   : > { %v1140_v27 = vadd.f32 1e-05, %v1139_v26 }
 0x52d   : > { %1594 = vrsqrt.f32 %v1140_v27  ;;  %vm1147_vm7 = vweird.f32 %v1140_v27 }
 0x533   : > { %v1595_v28 = vpop.eup %1594 }
 0x534   : > { %v1142_v29 = vmul.f32 %v1595_v28, %v1140_v27  ;;  %vm1148_vm6 = vweird.f32 %v1595_v28 }
 0x535   : > { %vm1149_vm8 = vmor %vm1147_vm7, %vm1148_vm6 }
 0x536   : > { %v1143_v30 = vmul.f32 %v1595_v28, %v1142_v29 }
 0x538   : > { %v1144_v59 = vmul.f32 0.5, %v1143_v30 }
 0x53a   : > { %v1145_v32 = vsub.f32 1.5, %v1144_v59 }
 0x53c   : > { %v1146_v33 = vmul.f32 %v1595_v28, %v1145_v32 }
 0x53e   : > { %v1150_v34 = vsel %vm1149_vm8, %v1595_v28, %v1146_v33 }
 0x53f   : > { %1451 = vmatmul.msk.f32.vlgmr.msrb.gmra.mxu3 %vm649_vm2, %v1150_v34 }
 0x5c2   : > { %v1171_v35 = vpop.f32.mrf.mxu3 }
 0x5c3   : > { %v1174_v36 = vmul.f32 %v1171_v35, %v1117_v23 }
 0x5c5   : > { %v1175_v37 = vmul.f32 %v1590_v31, %v1174_v36 }
 0x5c7   : > { %v1176_v38 = vadd.f32 %v1591_v58, %v1175_v37 }
 0x5c9   : > { %v1177_v39 = vpack.c.bf16 %v1176_v38, %v1176_v38 }
 0x5cb   : > { %1178 = vst [vmem:[%s2051_s22 + $0x4] sm:$0xf] %v1177_v39 }
 0x5cc   : > { %1743 = shalt.err (!%p1740_p0)
}
 0x5cd   : > { %1499 = dma.vmem_to_hbm [thread:$0]  (%p1938_p5), %s1195_s9, 128, %s1197_s10, %s1180_s13  }
 0x5ce PF: > { %s1208_s6 = sand.u32 1, %s1786_s15   ;;  %p1516_p3 = pnand %p1313_p11, %p1896_p6 }
 0x5cf   : > { %s1209_s14 = scalar_lea.sflag [#allocation4], %s1208_s6 }
 0x5d0   : > { %p1517_p7 = pneg %p1516_p3 }
 0x5d2   : > { %1781 = dma.done.wait (%p1517_p7), %s1209_s14, 128  }
 0x5d3   : > { %1783 = vsyncadd (%p1517_p7), %s1209_s14, 4294967168  ;;  %s22_s20 = sadd.s32 1, %s1806_s20   ;;  %s2111_s15 = smov %s1790_s16 }
 0x5d4   : > { %p19_p9 = scmp.ge.s32.totalorder %s22_s20, 4   ;;  %s2112_s16 = smov %s1794_s17 }
 0x5d5   : > { %s2113_s17 = smov %s1947_s11  ;;  %s2114_s18 = smov %s1802_s19 }
 0x5d6   : > { %s2115_s19 = smov %s2117_s29  ;;  %21 = sbr.rel (!%p19_p9) target bundleno = 10 (0xa), region = 106 }
 0x5db   :  { %1215 = vsyncpa [#allocation3], 1 }
 0x5dc   :  { %1217 = vsyncpa [#allocation3 + $0x1], 1 }
 0x5dd   :  { %1218 = vsyncpa [#allocation6], 1 }
 0x5de   :  { %1219 = vsyncpa [#allocation9], 1 }
 0x5df   :  { %1220 = vsyncpa [#allocation4], 1 }
 0x5e0   :  { %1222 = vsyncpa [#allocation4 + $0x1], 1 }

</bundles_post_ra>
